<compile_context>
chip_gen: v6e
topology: v6e:2x2x1
jax: 0.10.0
libtpu: 0.0.40
codegen_flags: <defaults>
</compile_context>

<pallas_src>
import jax
import jax.numpy as jnp
from jax import lax
from jax.experimental import pallas as pl
from jax.experimental.pallas import tpu as pltpu
import numpy as np

# ---- small, forward-consistent shapes ----
INPUT_SIZE = 16
HIDDEN_SIZE = 32
NUM_LAYERS = 2
BATCH = 2
SEQ = 8


def lstm_encoder_kernel(x2d_ref, w_ref, out_ref):
    """2-layer LSTM forward, whole problem resident in VMEM.

    x2d_ref: (T*B, I)       time-major input, flattened (row t*B + b == (t, b))
    w_ref:   (I+2H+1, 8H)   packed weights:
                              rows 0:I      -> W_x   (layer-0 input->gates,
                                               interleaved cols, layer-1 cols 0)
                              rows I:I+2H   -> W_rec (fused recurrent weight:
                                               rows 0:H multiply h0_prev,
                                               rows H:2H multiply h1_prev)
                              row  I+2H     -> b_cat (both layers' biases)
             column layout (8H): [i0 i1 | f0 f1 | o0 o1 | g0 g1], each width H
    out_ref: (B, 4H)        packed output lanes: [h0 | h1 | c0 | c1]
    """
    I = x2d_ref.shape[1]
    B = out_ref.shape[0]
    H = out_ref.shape[1] // 4
    H2 = 2 * H
    T = x2d_ref.shape[0] // B

    # zero-cost static slices of the single packed weight ref
    w_x = w_ref[0:I, :]                       # (I, 8H)
    w_rec = w_ref[I:I + H2, :]                # (2H, 8H)
    b_cat = w_ref[I + H2:I + H2 + 1, :]       # (1, 8H)

    # ---- hoisted input projection for layer 0 (no recurrent dependency):
    # one M=T*B matmul producing gates already in the interleaved layout with
    # both layers' biases folded in; nothing of this is on the per-step path.
    gx = (jnp.dot(x2d_ref[...], w_x, preferred_element_type=jnp.float32)
          + b_cat)                            # (T*B, 8H)

    def combine(gates, c_cat):
        # One sigmoid launch over the whole fused (B, 8H) gate vector (the
        # g-gate lanes are wasted but live in a vreg that is processed anyway),
        # one tanh over the g lanes, one tanh over the new cell: 3 EUP
        # launches per iteration for BOTH layers.
        sig = jax.nn.sigmoid(gates)
        g_c = jnp.tanh(gates[:, 3 * H2:4 * H2])   # [g0 | g1]
        i_c = sig[:, 0:H2]                        # [i0 | i1]
        f_c = sig[:, H2:2 * H2]                   # [f0 | f1]
        o_c = sig[:, 2 * H2:3 * H2]               # [o0 | o1]
        c_new = f_c * c_cat + i_c * g_c
        h_new = o_c * jnp.tanh(c_new)
        return h_new, c_new                       # both (B, 2H) = [layer0|layer1]

    # lane mask selecting the layer-0 half of the packed state
    lane = lax.broadcasted_iota(jnp.int32, (B, H2), 1)
    layer0_lanes = lane < H

    # ---- fully unrolled, layer-pipelined recurrence ----
    # prologue (t = 0): h0_prev = h1 = 0 -> no recurrent matmul needed; the
    # layer-1 half of the result is junk (bias-only gates) and is zeroed so
    # layer-1 starts from h1 = c1 = 0 at the next iteration.
    h_cat, c_cat = combine(gx[0:B, :], jnp.zeros((B, H2), jnp.float32))
    h_cat = jnp.where(layer0_lanes, h_cat, 0.0)
    c_cat = jnp.where(layer0_lanes, c_cat, 0.0)

    # steady state: iteration t runs layer-0 step t and layer-1 step t-1 with
    # ONE fused (B,2H)x(2H,8H) MXU matmul (both only depend on the previous
    # packed state [h0_{t-1} | h1_{t-2}]).
    for t in range(1, T):
        gates = (jnp.dot(h_cat, w_rec, preferred_element_type=jnp.float32)
                 + gx[t * B:(t + 1) * B, :])
        h_cat, c_cat = combine(gates, c_cat)

    # layer-0 final state is produced by iteration T-1
    h0_f = h_cat[:, 0:H]
    c0_f = c_cat[:, 0:H]

    # epilogue: layer-1 step T-1 (layer-0 half of this result is unused junk;
    # b_cat supplies the layer-1 bias, there is no gx row for "step T").
    gates = (jnp.dot(h_cat, w_rec, preferred_element_type=jnp.float32) + b_cat)
    h_cat, c_cat = combine(gates, c_cat)
    h1_f = h_cat[:, H:H2]
    c1_f = c_cat[:, H:H2]

    # single lane-dense (B, 4H) = (2, 128) store: [h0 | h1 | c0 | c1]
    out_ref[...] = jnp.concatenate([h0_f, h1_f, c0_f, c1_f], axis=1)


def _interleave_gate_cols(m0, m1):
    """m0, m1: (..., 4H) in PyTorch gate order [i, f, g, o].
    Returns (..., 8H) in kernel column order [i0 i1 | f0 f1 | o0 o1 | g0 g1]
    (all sigmoid gates first, tanh 'g' gates last)."""
    H = m0.shape[-1] // 4
    blocks = []
    for k in (0, 1, 3, 2):   # i, f, o, g
        blocks.append(m0[..., k * H:(k + 1) * H])
        blocks.append(m1[..., k * H:(k + 1) * H])
    return jnp.concatenate(blocks, axis=-1)


def encoder_forward(x, params):
    """x: (batch, seq, input) float32, PyTorch batch_first convention.
    Returns (hidden, cell), each (num_layers, batch, hidden)."""
    B, T, I = x.shape
    H = params["whh0"].shape[1]        # whh0 is PyTorch-shaped (4H, H)
    H4 = 4 * H

    # ---- layout glue (plain JAX, outside the kernel) ----
    wih0_T = params["wih0"].T          # (I, 4H)
    whh0_T = params["whh0"].T          # (H, 4H)
    wih1_T = params["wih1"].T          # (H, 4H)
    whh1_T = params["whh1"].T          # (H, 4H)
    b0 = (params["bih0"] + params["bhh0"]).reshape(1, H4)
    b1 = (params["bih1"] + params["bhh1"]).reshape(1, H4)

    # layer-0 input weight expanded to the interleaved 8H gate layout
    w_x = _interleave_gate_cols(wih0_T, jnp.zeros((I, H4), jnp.float32))   # (I, 8H)
    # fused recurrent block weight: rows 0:H <- h0_prev, rows H:2H <- h1_prev
    w_rec = jnp.concatenate([
        _interleave_gate_cols(whh0_T, wih1_T),                             # (H, 8H)
        _interleave_gate_cols(jnp.zeros((H, H4), jnp.float32), whh1_T),    # (H, 8H)
    ], axis=0)                                                             # (2H, 8H)
    b_cat = _interleave_gate_cols(b0, b1)                                  # (1, 8H)

    # single packed weight slab -> one input DMA
    w_packed = jnp.concatenate([w_x, w_rec, b_cat], axis=0)                # (I+2H+1, 8H)

    # time-major, flattened to (T*B, I) so the kernel's hoisted projection is a
    # single matmul with no in-kernel reshape.
    x2d = jnp.transpose(x, (1, 0, 2)).reshape(T * B, I)

    vmem = pl.BlockSpec(memory_space=pltpu.MemorySpace.VMEM)
    out = pl.pallas_call(
        lstm_encoder_kernel,
        out_shape=jax.ShapeDtypeStruct((B, H4), jnp.float32),
        in_specs=[vmem, vmem],
        out_specs=vmem,
    )(x2d, w_packed)

    hidden = jnp.stack([out[:, 0:H], out[:, H:2 * H]], axis=0)       # (2, B, H)
    cell = jnp.stack([out[:, 2 * H:3 * H], out[:, 3 * H:4 * H]], axis=0)
    return hidden, cell


def init_params(key, input_size, hidden_size):
    """Deterministic synthetic params, PyTorch nn.LSTM shapes & init range."""
    bound = 1.0 / np.sqrt(hidden_size)
    ks = jax.random.split(key, 8)
    u = lambda k, shape: jax.random.uniform(k, shape, jnp.float32, -bound, bound)
    H4 = 4 * hidden_size
    return {
        "wih0": u(ks[0], (H4, input_size)),
        "whh0": u(ks[1], (H4, hidden_size)),
        "bih0": u(ks[2], (H4,)),
        "bhh0": u(ks[3], (H4,)),
        "wih1": u(ks[4], (H4, hidden_size)),
        "whh1": u(ks[5], (H4, hidden_size)),
        "bih1": u(ks[6], (H4,)),
        "bhh1": u(ks[7], (H4,)),
    }


def encoder_forward_ref(x, params):
    """Pure-JAX reference (PyTorch nn.LSTM math), for correctness checking."""
    B, T, I = x.shape
    H = params["whh0"].shape[0] // 4

    def layer(seq_in, wih, whh, bih, bhh):
        def step(carry, x_t):
            h, c = carry
            gates = x_t @ wih.T + bih + h @ whh.T + bhh
            i = jax.nn.sigmoid(gates[:, 0 * H:1 * H])
            f = jax.nn.sigmoid(gates[:, 1 * H:2 * H])
            g = jnp.tanh(gates[:, 2 * H:3 * H])
            o = jax.nn.sigmoid(gates[:, 3 * H:4 * H])
            c = f * c + i * g
            h = o * jnp.tanh(c)
            return (h, c), h

        init = (jnp.zeros((B, H), jnp.float32), jnp.zeros((B, H), jnp.float32))
        (h, c), outs = lax.scan(step, init, jnp.transpose(seq_in, (1, 0, 2)))
        return jnp.transpose(outs, (1, 0, 2)), h, c

    out0, h0, c0 = layer(x, params["wih0"], params["whh0"],
                         params["bih0"], params["bhh0"])
    _, h1, c1 = layer(out0, params["wih1"], params["whh1"],
                      params["bih1"], params["bhh1"])
    return jnp.stack([h0, h1]), jnp.stack([c0, c1])


if __name__ == "__main__":
    key = jax.random.PRNGKey(0)
    kx, kp = jax.random.split(key)
    x = jax.random.normal(kx, (BATCH, SEQ, INPUT_SIZE), jnp.float32)
    params = init_params(kp, INPUT_SIZE, HIDDEN_SIZE)

    hidden, cell = encoder_forward(x, params)
    jax.block_until_ready((hidden, cell))

    hidden_ref, cell_ref = encoder_forward_ref(x, params)
    np.testing.assert_allclose(np.asarray(hidden), np.asarray(hidden_ref),
                               rtol=1e-5, atol=1e-5)
    np.testing.assert_allclose(np.asarray(cell), np.asarray(cell_ref),
                               rtol=1e-5, atol=1e-5)

    assert hidden.shape == (NUM_LAYERS, BATCH, HIDDEN_SIZE)
    assert cell.shape == (NUM_LAYERS, BATCH, HIDDEN_SIZE)
    print("KERNEL_OK")
</pallas_src>

<mosaic_0001>
module attributes {stable_mosaic.version = 11 : i64} {
  func.func @lstm_encoder_kernel(%arg0: memref<16x16xf32, #tpu.memory_space<vmem>>, %arg1: memref<81x256xf32, #tpu.memory_space<vmem>>, %arg2: memref<2x128xf32, #tpu.memory_space<vmem>>) attributes {dimension_semantics = [], scalar_prefetch = 0 : i64, scratch_operands = 0 : i64, tpu.core_type = #tpu.core_type<tc>} {
    %c0 = arith.constant 0 : index
    %c0_0 = arith.constant 0 : index
    %0 = vector.load %arg1[%c0, %c0_0] : memref<81x256xf32, #tpu.memory_space<vmem>>, vector<16x256xf32>
    %c16 = arith.constant 16 : index
    %c0_1 = arith.constant 0 : index
    %1 = vector.load %arg1[%c16, %c0_1] : memref<81x256xf32, #tpu.memory_space<vmem>>, vector<64x256xf32>
    %c80 = arith.constant 80 : index
    %c0_2 = arith.constant 0 : index
    %2 = vector.load %arg1[%c80, %c0_2] : memref<81x256xf32, #tpu.memory_space<vmem>>, vector<1x256xf32>
    %c0_3 = arith.constant 0 : index
    %c0_4 = arith.constant 0 : index
    %3 = vector.load %arg0[%c0_3, %c0_4] : memref<16x16xf32, #tpu.memory_space<vmem>>, vector<16x16xf32>
    %cst = arith.constant dense<0.000000e+00> : vector<16x256xf32>
    %4 = tpu.matmul %3, %0, %cst {dimension_numbers = #tpu.dot_dimension_numbers<[1], [0], [0], [1], [0, 0, 1, 1], [], []>} : vector<16x16xf32>, vector<16x256xf32>, vector<16x256xf32> -> vector<16x256xf32>
    %5 = vector.broadcast %2 : vector<1x256xf32> to vector<16x256xf32>
    %6 = arith.addf %4, %5 : vector<16x256xf32>
    %7 = tpu.iota {dimensions = array<i32: 1>} : vector<2x64xi32>
    %c32_i32 = arith.constant 32 : i32
    %8 = vector.broadcast %c32_i32 : i32 to vector<2x64xi32>
    %9 = arith.cmpi slt, %7, %8 : vector<2x64xi32>
    %10 = vector.extract_strided_slice %6 {offsets = [0, 0], sizes = [2, 256], strides = [1, 1]} : vector<16x256xf32> to vector<2x256xf32>
    %cst_5 = arith.constant 0.000000e+00 : f32
    %11 = vector.broadcast %cst_5 : f32 to vector<2x64xf32>
    %12 = arith.negf %10 : vector<2x256xf32>
    %13 = math.exp %12 : vector<2x256xf32>
    %cst_6 = arith.constant 1.000000e+00 : f32
    %14 = vector.broadcast %cst_6 : f32 to vector<2x256xf32>
    %15 = arith.addf %14, %13 : vector<2x256xf32>
    %16 = arith.divf %14, %15 : vector<2x256xf32>
    %17 = vector.extract_strided_slice %10 {offsets = [0, 192], sizes = [2, 64], strides = [1, 1]} : vector<2x256xf32> to vector<2x64xf32>
    %18 = math.tanh %17 : vector<2x64xf32>
    %19 = vector.extract_strided_slice %16 {offsets = [0, 0], sizes = [2, 64], strides = [1, 1]} : vector<2x256xf32> to vector<2x64xf32>
    %20 = vector.extract_strided_slice %16 {offsets = [0, 64], sizes = [2, 64], strides = [1, 1]} : vector<2x256xf32> to vector<2x64xf32>
    %21 = vector.extract_strided_slice %16 {offsets = [0, 128], sizes = [2, 64], strides = [1, 1]} : vector<2x256xf32> to vector<2x64xf32>
    %22 = arith.mulf %20, %11 : vector<2x64xf32>
    %23 = arith.mulf %19, %18 : vector<2x64xf32>
    %24 = arith.addf %22, %23 : vector<2x64xf32>
    %25 = math.tanh %24 : vector<2x64xf32>
    %26 = arith.mulf %21, %25 : vector<2x64xf32>
    %cst_7 = arith.constant 0.000000e+00 : f32
    %27 = vector.broadcast %cst_7 : f32 to vector<2x64xf32>
    %28 = arith.select %9, %26, %27 : vector<2x64xi1>, vector<2x64xf32>
    %cst_8 = arith.constant 0.000000e+00 : f32
    %29 = vector.broadcast %cst_8 : f32 to vector<2x64xf32>
    %30 = arith.select %9, %24, %29 : vector<2x64xi1>, vector<2x64xf32>
    %cst_9 = arith.constant dense<0.000000e+00> : vector<2x256xf32>
    %31 = tpu.matmul %28, %1, %cst_9 {dimension_numbers = #tpu.dot_dimension_numbers<[1], [0], [0], [1], [0, 0, 1, 1], [], []>} : vector<2x64xf32>, vector<64x256xf32>, vector<2x256xf32> -> vector<2x256xf32>
    %32 = vector.extract_strided_slice %6 {offsets = [2, 0], sizes = [2, 256], strides = [1, 1]} : vector<16x256xf32> to vector<2x256xf32>
    %33 = arith.addf %31, %32 : vector<2x256xf32>
    %34 = arith.negf %33 : vector<2x256xf32>
    %35 = math.exp %34 : vector<2x256xf32>
    %cst_10 = arith.constant 1.000000e+00 : f32
    %36 = vector.broadcast %cst_10 : f32 to vector<2x256xf32>
    %37 = arith.addf %36, %35 : vector<2x256xf32>
    %38 = arith.divf %36, %37 : vector<2x256xf32>
    %39 = vector.extract_strided_slice %33 {offsets = [0, 192], sizes = [2, 64], strides = [1, 1]} : vector<2x256xf32> to vector<2x64xf32>
    %40 = math.tanh %39 : vector<2x64xf32>
    %41 = vector.extract_strided_slice %38 {offsets = [0, 0], sizes = [2, 64], strides = [1, 1]} : vector<2x256xf32> to vector<2x64xf32>
    %42 = vector.extract_strided_slice %38 {offsets = [0, 64], sizes = [2, 64], strides = [1, 1]} : vector<2x256xf32> to vector<2x64xf32>
    %43 = vector.extract_strided_slice %38 {offsets = [0, 128], sizes = [2, 64], strides = [1, 1]} : vector<2x256xf32> to vector<2x64xf32>
    %44 = arith.mulf %42, %30 : vector<2x64xf32>
    %45 = arith.mulf %41, %40 : vector<2x64xf32>
    %46 = arith.addf %44, %45 : vector<2x64xf32>
    %47 = math.tanh %46 : vector<2x64xf32>
    %48 = arith.mulf %43, %47 : vector<2x64xf32>
    %cst_11 = arith.constant dense<0.000000e+00> : vector<2x256xf32>
    %49 = tpu.matmul %48, %1, %cst_11 {dimension_numbers = #tpu.dot_dimension_numbers<[1], [0], [0], [1], [0, 0, 1, 1], [], []>} : vector<2x64xf32>, vector<64x256xf32>, vector<2x256xf32> -> vector<2x256xf32>
    %50 = vector.extract_strided_slice %6 {offsets = [4, 0], sizes = [2, 256], strides = [1, 1]} : vector<16x256xf32> to vector<2x256xf32>
    %51 = arith.addf %49, %50 : vector<2x256xf32>
    %52 = arith.negf %51 : vector<2x256xf32>
    %53 = math.exp %52 : vector<2x256xf32>
    %cst_12 = arith.constant 1.000000e+00 : f32
    %54 = vector.broadcast %cst_12 : f32 to vector<2x256xf32>
    %55 = arith.addf %54, %53 : vector<2x256xf32>
    %56 = arith.divf %54, %55 : vector<2x256xf32>
    %57 = vector.extract_strided_slice %51 {offsets = [0, 192], sizes = [2, 64], strides = [1, 1]} : vector<2x256xf32> to vector<2x64xf32>
    %58 = math.tanh %57 : vector<2x64xf32>
    %59 = vector.extract_strided_slice %56 {offsets = [0, 0], sizes = [2, 64], strides = [1, 1]} : vector<2x256xf32> to vector<2x64xf32>
    %60 = vector.extract_strided_slice %56 {offsets = [0, 64], sizes = [2, 64], strides = [1, 1]} : vector<2x256xf32> to vector<2x64xf32>
    %61 = vector.extract_strided_slice %56 {offsets = [0, 128], sizes = [2, 64], strides = [1, 1]} : vector<2x256xf32> to vector<2x64xf32>
    %62 = arith.mulf %60, %46 : vector<2x64xf32>
    %63 = arith.mulf %59, %58 : vector<2x64xf32>
    %64 = arith.addf %62, %63 : vector<2x64xf32>
    %65 = math.tanh %64 : vector<2x64xf32>
    %66 = arith.mulf %61, %65 : vector<2x64xf32>
    %cst_13 = arith.constant dense<0.000000e+00> : vector<2x256xf32>
    %67 = tpu.matmul %66, %1, %cst_13 {dimension_numbers = #tpu.dot_dimension_numbers<[1], [0], [0], [1], [0, 0, 1, 1], [], []>} : vector<2x64xf32>, vector<64x256xf32>, vector<2x256xf32> -> vector<2x256xf32>
    %68 = vector.extract_strided_slice %6 {offsets = [6, 0], sizes = [2, 256], strides = [1, 1]} : vector<16x256xf32> to vector<2x256xf32>
    %69 = arith.addf %67, %68 : vector<2x256xf32>
    %70 = arith.negf %69 : vector<2x256xf32>
    %71 = math.exp %70 : vector<2x256xf32>
    %cst_14 = arith.constant 1.000000e+00 : f32
    %72 = vector.broadcast %cst_14 : f32 to vector<2x256xf32>
    %73 = arith.addf %72, %71 : vector<2x256xf32>
    %74 = arith.divf %72, %73 : vector<2x256xf32>
    %75 = vector.extract_strided_slice %69 {offsets = [0, 192], sizes = [2, 64], strides = [1, 1]} : vector<2x256xf32> to vector<2x64xf32>
    %76 = math.tanh %75 : vector<2x64xf32>
    %77 = vector.extract_strided_slice %74 {offsets = [0, 0], sizes = [2, 64], strides = [1, 1]} : vector<2x256xf32> to vector<2x64xf32>
    %78 = vector.extract_strided_slice %74 {offsets = [0, 64], sizes = [2, 64], strides = [1, 1]} : vector<2x256xf32> to vector<2x64xf32>
    %79 = vector.extract_strided_slice %74 {offsets = [0, 128], sizes = [2, 64], strides = [1, 1]} : vector<2x256xf32> to vector<2x64xf32>
    %80 = arith.mulf %78, %64 : vector<2x64xf32>
    %81 = arith.mulf %77, %76 : vector<2x64xf32>
    %82 = arith.addf %80, %81 : vector<2x64xf32>
    %83 = math.tanh %82 : vector<2x64xf32>
    %84 = arith.mulf %79, %83 : vector<2x64xf32>
    %cst_15 = arith.constant dense<0.000000e+00> : vector<2x256xf32>
    %85 = tpu.matmul %84, %1, %cst_15 {dimension_numbers = #tpu.dot_dimension_numbers<[1], [0], [0], [1], [0, 0, 1, 1], [], []>} : vector<2x64xf32>, vector<64x256xf32>, vector<2x256xf32> -> vector<2x256xf32>
    %86 = vector.extract_strided_slice %6 {offsets = [8, 0], sizes = [2, 256], strides = [1, 1]} : vector<16x256xf32> to vector<2x256xf32>
    %87 = arith.addf %85, %86 : vector<2x256xf32>
    %88 = arith.negf %87 : vector<2x256xf32>
    %89 = math.exp %88 : vector<2x256xf32>
    %cst_16 = arith.constant 1.000000e+00 : f32
    %90 = vector.broadcast %cst_16 : f32 to vector<2x256xf32>
    %91 = arith.addf %90, %89 : vector<2x256xf32>
    %92 = arith.divf %90, %91 : vector<2x256xf32>
    %93 = vector.extract_strided_slice %87 {offsets = [0, 192], sizes = [2, 64], strides = [1, 1]} : vector<2x256xf32> to vector<2x64xf32>
    %94 = math.tanh %93 : vector<2x64xf32>
    %95 = vector.extract_strided_slice %92 {offsets = [0, 0], sizes = [2, 64], strides = [1, 1]} : vector<2x256xf32> to vector<2x64xf32>
    %96 = vector.extract_strided_slice %92 {offsets = [0, 64], sizes = [2, 64], strides = [1, 1]} : vector<2x256xf32> to vector<2x64xf32>
    %97 = vector.extract_strided_slice %92 {offsets = [0, 128], sizes = [2, 64], strides = [1, 1]} : vector<2x256xf32> to vector<2x64xf32>
    %98 = arith.mulf %96, %82 : vector<2x64xf32>
    %99 = arith.mulf %95, %94 : vector<2x64xf32>
    %100 = arith.addf %98, %99 : vector<2x64xf32>
    %101 = math.tanh %100 : vector<2x64xf32>
    %102 = arith.mulf %97, %101 : vector<2x64xf32>
    %cst_17 = arith.constant dense<0.000000e+00> : vector<2x256xf32>
    %103 = tpu.matmul %102, %1, %cst_17 {dimension_numbers = #tpu.dot_dimension_numbers<[1], [0], [0], [1], [0, 0, 1, 1], [], []>} : vector<2x64xf32>, vector<64x256xf32>, vector<2x256xf32> -> vector<2x256xf32>
    %104 = vector.extract_strided_slice %6 {offsets = [10, 0], sizes = [2, 256], strides = [1, 1]} : vector<16x256xf32> to vector<2x256xf32>
    %105 = arith.addf %103, %104 : vector<2x256xf32>
    %106 = arith.negf %105 : vector<2x256xf32>
    %107 = math.exp %106 : vector<2x256xf32>
    %cst_18 = arith.constant 1.000000e+00 : f32
    %108 = vector.broadcast %cst_18 : f32 to vector<2x256xf32>
    %109 = arith.addf %108, %107 : vector<2x256xf32>
    %110 = arith.divf %108, %109 : vector<2x256xf32>
    %111 = vector.extract_strided_slice %105 {offsets = [0, 192], sizes = [2, 64], strides = [1, 1]} : vector<2x256xf32> to vector<2x64xf32>
    %112 = math.tanh %111 : vector<2x64xf32>
    %113 = vector.extract_strided_slice %110 {offsets = [0, 0], sizes = [2, 64], strides = [1, 1]} : vector<2x256xf32> to vector<2x64xf32>
    %114 = vector.extract_strided_slice %110 {offsets = [0, 64], sizes = [2, 64], strides = [1, 1]} : vector<2x256xf32> to vector<2x64xf32>
    %115 = vector.extract_strided_slice %110 {offsets = [0, 128], sizes = [2, 64], strides = [1, 1]} : vector<2x256xf32> to vector<2x64xf32>
    %116 = arith.mulf %114, %100 : vector<2x64xf32>
    %117 = arith.mulf %113, %112 : vector<2x64xf32>
    %118 = arith.addf %116, %117 : vector<2x64xf32>
    %119 = math.tanh %118 : vector<2x64xf32>
    %120 = arith.mulf %115, %119 : vector<2x64xf32>
    %cst_19 = arith.constant dense<0.000000e+00> : vector<2x256xf32>
    %121 = tpu.matmul %120, %1, %cst_19 {dimension_numbers = #tpu.dot_dimension_numbers<[1], [0], [0], [1], [0, 0, 1, 1], [], []>} : vector<2x64xf32>, vector<64x256xf32>, vector<2x256xf32> -> vector<2x256xf32>
    %122 = vector.extract_strided_slice %6 {offsets = [12, 0], sizes = [2, 256], strides = [1, 1]} : vector<16x256xf32> to vector<2x256xf32>
    %123 = arith.addf %121, %122 : vector<2x256xf32>
    %124 = arith.negf %123 : vector<2x256xf32>
    %125 = math.exp %124 : vector<2x256xf32>
    %cst_20 = arith.constant 1.000000e+00 : f32
    %126 = vector.broadcast %cst_20 : f32 to vector<2x256xf32>
    %127 = arith.addf %126, %125 : vector<2x256xf32>
    %128 = arith.divf %126, %127 : vector<2x256xf32>
    %129 = vector.extract_strided_slice %123 {offsets = [0, 192], sizes = [2, 64], strides = [1, 1]} : vector<2x256xf32> to vector<2x64xf32>
    %130 = math.tanh %129 : vector<2x64xf32>
    %131 = vector.extract_strided_slice %128 {offsets = [0, 0], sizes = [2, 64], strides = [1, 1]} : vector<2x256xf32> to vector<2x64xf32>
    %132 = vector.extract_strided_slice %128 {offsets = [0, 64], sizes = [2, 64], strides = [1, 1]} : vector<2x256xf32> to vector<2x64xf32>
    %133 = vector.extract_strided_slice %128 {offsets = [0, 128], sizes = [2, 64], strides = [1, 1]} : vector<2x256xf32> to vector<2x64xf32>
    %134 = arith.mulf %132, %118 : vector<2x64xf32>
    %135 = arith.mulf %131, %130 : vector<2x64xf32>
    %136 = arith.addf %134, %135 : vector<2x64xf32>
    %137 = math.tanh %136 : vector<2x64xf32>
    %138 = arith.mulf %133, %137 : vector<2x64xf32>
    %cst_21 = arith.constant dense<0.000000e+00> : vector<2x256xf32>
    %139 = tpu.matmul %138, %1, %cst_21 {dimension_numbers = #tpu.dot_dimension_numbers<[1], [0], [0], [1], [0, 0, 1, 1], [], []>} : vector<2x64xf32>, vector<64x256xf32>, vector<2x256xf32> -> vector<2x256xf32>
    %140 = vector.extract_strided_slice %6 {offsets = [14, 0], sizes = [2, 256], strides = [1, 1]} : vector<16x256xf32> to vector<2x256xf32>
    %141 = arith.addf %139, %140 : vector<2x256xf32>
    %142 = arith.negf %141 : vector<2x256xf32>
    %143 = math.exp %142 : vector<2x256xf32>
    %cst_22 = arith.constant 1.000000e+00 : f32
    %144 = vector.broadcast %cst_22 : f32 to vector<2x256xf32>
    %145 = arith.addf %144, %143 : vector<2x256xf32>
    %146 = arith.divf %144, %145 : vector<2x256xf32>
    %147 = vector.extract_strided_slice %141 {offsets = [0, 192], sizes = [2, 64], strides = [1, 1]} : vector<2x256xf32> to vector<2x64xf32>
    %148 = math.tanh %147 : vector<2x64xf32>
    %149 = vector.extract_strided_slice %146 {offsets = [0, 0], sizes = [2, 64], strides = [1, 1]} : vector<2x256xf32> to vector<2x64xf32>
    %150 = vector.extract_strided_slice %146 {offsets = [0, 64], sizes = [2, 64], strides = [1, 1]} : vector<2x256xf32> to vector<2x64xf32>
    %151 = vector.extract_strided_slice %146 {offsets = [0, 128], sizes = [2, 64], strides = [1, 1]} : vector<2x256xf32> to vector<2x64xf32>
    %152 = arith.mulf %150, %136 : vector<2x64xf32>
    %153 = arith.mulf %149, %148 : vector<2x64xf32>
    %154 = arith.addf %152, %153 : vector<2x64xf32>
    %155 = math.tanh %154 : vector<2x64xf32>
    %156 = arith.mulf %151, %155 : vector<2x64xf32>
    %157 = vector.extract_strided_slice %156 {offsets = [0, 0], sizes = [2, 32], strides = [1, 1]} : vector<2x64xf32> to vector<2x32xf32>
    %158 = vector.extract_strided_slice %154 {offsets = [0, 0], sizes = [2, 32], strides = [1, 1]} : vector<2x64xf32> to vector<2x32xf32>
    %cst_23 = arith.constant dense<0.000000e+00> : vector<2x256xf32>
    %159 = tpu.matmul %156, %1, %cst_23 {dimension_numbers = #tpu.dot_dimension_numbers<[1], [0], [0], [1], [0, 0, 1, 1], [], []>} : vector<2x64xf32>, vector<64x256xf32>, vector<2x256xf32> -> vector<2x256xf32>
    %160 = vector.broadcast %2 : vector<1x256xf32> to vector<2x256xf32>
    %161 = arith.addf %159, %160 : vector<2x256xf32>
    %162 = arith.negf %161 : vector<2x256xf32>
    %163 = math.exp %162 : vector<2x256xf32>
    %cst_24 = arith.constant 1.000000e+00 : f32
    %164 = vector.broadcast %cst_24 : f32 to vector<2x256xf32>
    %165 = arith.addf %164, %163 : vector<2x256xf32>
    %166 = arith.divf %164, %165 : vector<2x256xf32>
    %167 = vector.extract_strided_slice %161 {offsets = [0, 192], sizes = [2, 64], strides = [1, 1]} : vector<2x256xf32> to vector<2x64xf32>
    %168 = math.tanh %167 : vector<2x64xf32>
    %169 = vector.extract_strided_slice %166 {offsets = [0, 0], sizes = [2, 64], strides = [1, 1]} : vector<2x256xf32> to vector<2x64xf32>
    %170 = vector.extract_strided_slice %166 {offsets = [0, 64], sizes = [2, 64], strides = [1, 1]} : vector<2x256xf32> to vector<2x64xf32>
    %171 = vector.extract_strided_slice %166 {offsets = [0, 128], sizes = [2, 64], strides = [1, 1]} : vector<2x256xf32> to vector<2x64xf32>
    %172 = arith.mulf %170, %154 : vector<2x64xf32>
    %173 = arith.mulf %169, %168 : vector<2x64xf32>
    %174 = arith.addf %172, %173 : vector<2x64xf32>
    %175 = math.tanh %174 : vector<2x64xf32>
    %176 = arith.mulf %171, %175 : vector<2x64xf32>
    %177 = vector.extract_strided_slice %176 {offsets = [0, 32], sizes = [2, 32], strides = [1, 1]} : vector<2x64xf32> to vector<2x32xf32>
    %178 = vector.extract_strided_slice %174 {offsets = [0, 32], sizes = [2, 32], strides = [1, 1]} : vector<2x64xf32> to vector<2x32xf32>
    %179 = tpu.concatenate %157, %177, %158, %178 in 1 : vector<2x32xf32>, vector<2x32xf32>, vector<2x32xf32>, vector<2x32xf32> -> vector<2x128xf32>
    %c0_25 = arith.constant 0 : index
    %c0_26 = arith.constant 0 : index
    %180 = vector.load %arg2[%c0_25, %c0_26] : memref<2x128xf32, #tpu.memory_space<vmem>>, vector<2x128xf32>
    tpu.vector_store %arg2[%c0_25, %c0_26], %179 {strides = array<i32>} : memref<2x128xf32, #tpu.memory_space<vmem>>, vector<2x128xf32>,
    return
  }
}

</mosaic_0001>

<bundles_post_ra>
// kernel: tpu_custom_call.1
= control target key start
LH: loop header
LB: loop body
LE: loop exit
PB: predicated region body
PF: predicated region fallthrough
CT: control target
= control target key end

     0   :  { %7 = vsyncpa [#allocation3], 0  ;;  %s1582_s0 = inlined_call_operand.hbm [shape: f32[16,16], index: 0, kind: input, shape index: {}]   ;;  %s1583_s1 = inlined_call_operand.hbm [shape: f32[81,256], index: 1, kind: input, shape index: {}]   ;;  %s1584_s2 = inlined_call_operand.hbm [shape: f32[2,128], index: 2, kind: output, shape index: {}]  }
   0x1   :  { %8 = vsyncpa [#allocation6], 0 }
   0x2   :  { %9 = vsyncpa [#allocation4], 0  ;;  %s1296_s9 = smov [#allocation2]  }
   0x3   :  { %s15_s10 = sshll.u32 %s1296_s9, 4  ;;  %s16_s10 = int_to_ptr.vmem [resolvable:$true] %s15_s10 }
   0x4   :  { %s1238_s11 = scalar_lea.vmem %s16_s10, 256  ;;  %p1243_p1 = scmp.lt.s32.totalorder %s16_s10, %s16_s10 }
   0x5   :  { %p1239_p0 = scmp.ne.s32.totalorder %s16_s10, %s1238_s11  ;;  %p1244_p2 = scmp.lt.s32.totalorder %s1238_s11, %s1238_s11 }
   0x7   :  { %p1245_p3 = por %p1244_p2, %p1243_p1 }
   0x9   :  { %p1246_p4 = pnand %p1245_p3, %p1239_p0 }
   0xb   :  { %1249 = shalt.err (!%p1246_p4)
}
   0xc   :  { %s1297_s12 = smov 128   ;;  %s1298_s13 = smov 8  }
   0xd   :  { %21 = dma.hbm_to_vmem [thread:$0]  %s1582_s0, 256, %s16_s10, [#allocation3], %s1297_s12, %s1297_s12, %s1298_s13  }
   0xe   :  { %s1299_s16 = smov [#allocation5]  }
   0xf   :  { %s27_s17 = sshll.u32 %s1299_s16, 4  ;;  %s28_s17 = int_to_ptr.vmem [resolvable:$true] %s27_s17 }
  0x10   :  { %s1258_s18 = scalar_lea.vmem %s28_s17, 2816  ;;  %p1263_p6 = scmp.lt.s32.totalorder %s28_s17, %s28_s17 }
  0x11   :  { %p1259_p5 = scmp.ne.s32.totalorder %s28_s17, %s1258_s18  ;;  %p1264_p7 = scmp.lt.s32.totalorder %s1258_s18, %s1258_s18 }
  0x13   :  { %p1265_p8 = por %p1264_p7, %p1263_p6 }
  0x15   :  { %p1266_p9 = pnand %p1265_p8, %p1259_p5 }
  0x17   :  { %1269 = shalt.err (!%p1266_p9)
}
  0x18   :  { %s1300_s19 = smov 256   ;;  %s1301_s20 = smov 16  }
  0x19   :  { %33 = dma.hbm_to_vmem [thread:$0]  %s1583_s1, 2816, %s28_s17, [#allocation6], %s1300_s19, %s1300_s19, %s1301_s20  }
  0x1a   :  { %1290 = dma.done.wait [#allocation3], 256  }
  0x1b   :  { %1291 = vsyncadd [#allocation3], 4294967040 }
  0x1c   :  { %1292 = dma.done.wait [#allocation6], 2816  }
  0x1d   :  { %1293 = vsyncadd [#allocation6], 4294964480  ;;  %v1302_v0 = vmov 0.0   ;;  %v43_v1 = vld [vmem:[#allocation5 + $0x18] sm:$0xff]  ;;  %v42_v2 = vld [vmem:[#allocation5 + $0x10] sm:$0xff]  ;;  %vm75_vm0 = vcmask 130048   ;;  %v65_v6 = vlaneseq }
  0x1e   :  { %146 = vmatprep.mubr.f32.mxu0 %v1302_v0  ;;  %272 = vmatprep.mubr.f32.mxu1 %v1302_v0  ;;  %v41_v3 = vld [vmem:[#allocation5 + $0x8] sm:$0xff]  ;;  %v40_v4 = vld [vmem:[#allocation5] sm:$0xff]  ;;  %v62_v5 = vld [vmem:[#allocation2] sm:$0xff]  ;;  %s1303_s0 = smov 64   ;;  %vm204_vm2 = vcmask 523264   ;;  %vm1063_vm3 = vcmask 261120  }
  0x1f   :  { %110 = vmatprep.subr.mxu0 %v43_v1  ;;  %v66_v7 = vshrl.u32 %v65_v6, 7  ;;  %v61_v9 = vld [vmem:[#allocation5 + $0xa0] ss:$8 sm:$0x3]  ;;  %v1345_v24 = vld [vmem:[#allocation5 + $0x98] sm:$0xff]  ;;  %v1347_v25 = vld [vmem:[#allocation5 + $0x90] sm:$0xff] }
  0x20   :  { %111 = vmatpush1.msra.mxu0 %v42_v2  ;;  %v1349_v26 = vld [vmem:[#allocation5 + $0x88] sm:$0xff]  ;;  %224 = vmatprep.subr.mxu1 %v1345_v24  ;;  %v1352_v27 = vld [vmem:[#allocation5 + $0x80] sm:$0xff]  ;;  %v1356_v28 = vld [vmem:[#allocation5 + $0x78] sm:$0xff]  ;;  %v160_v47 = vand.u32 127, %v65_v6  ;;  %s1304_s1 = smov [#allocation7]   ;;  %vm1066_vm4 = vcmask 785408  }
  0x21   :  { %112 = vmatprep.subr.mxu0 %v41_v3  ;;  %v71_v8 = vsub.s32 1, %v66_v7  ;;  %v67_v15 = vsub.s32 0, %v66_v7  ;;  %225 = vmatpush1.msra.mxu1 %v1347_v25  ;;  %v1360_v29 = vld [vmem:[#allocation5 + $0x70] sm:$0xff]  ;;  %v1364_v30 = vld [vmem:[#allocation5 + $0x68] sm:$0xff]  ;;  %v1368_v31 = vld [vmem:[#allocation5 + $0x60] sm:$0xff]  ;;  %s1075_s23 = sshll.u32 %s1304_s1, 4  ;;  %s1076_s23 = int_to_ptr.vmem [resolvable:$true] %s1075_s23 }
  0x22   :  { %113 = vmatpush1.msra.mxu0 %v40_v4  ;;  %226 = vmatprep.subr.mxu1 %v1349_v26  ;;  %v1372_v32 = vld [vmem:[#allocation5 + $0x58] sm:$0xff]  ;;  %v1376_v33 = vld [vmem:[#allocation5 + $0x50] sm:$0xff]  ;;  %v1380_v34 = vld [vmem:[#allocation5 + $0x48] sm:$0xff]  ;;  %vm161_vm1 = vcmp.lt.s32.totalorder %v160_v47, 32  ;;  %s1270_s24 = scalar_lea.vmem %s1076_s23, 32  ;;  %p1275_p11 = scmp.lt.s32.totalorder %s1076_s23, %s1076_s23 }
  0x23   :  { %1085 = vmatmul.mubr.msk.f32.vlgmr.msra.gmra.mxu0 %vm75_vm0, %v62_v5  ;;  %v1331_v10 = vrot.slane %v61_v9, %v71_v8  ;;  %v1338_v16 = vrot.slane %v61_v9, %v67_v15  ;;  %336 = vmatprep.subr.mxu0 %v1345_v24  ;;  %v1384_v35 = vld [vmem:[#allocation5 + $0x40] sm:$0xff]  ;;  %v1388_v36 = vld [vmem:[#allocation5 + $0x38] sm:$0xff]  ;;  %v1397_v40 = vld [vmem:[#allocation5 + $0x30] sm:$0xff]  ;;  %p1271_p10 = scmp.ne.s32.totalorder %s1076_s23, %s1270_s24  ;;  %p1276_p12 = scmp.lt.s32.totalorder %s1270_s24, %s1270_s24 }
  0x24   :  { %152 = vmatprep.mubr.f32.mxu0 %v1302_v0  ;;  %337 = vmatpush1.msra.mxu0 %v1347_v25  ;;  %v1400_v41 = vld [vmem:[#allocation5 + $0x28] sm:$0xff]  ;;  %v1404_v42 = vld [vmem:[#allocation5 + $0x20] sm:$0xff]  ;;  %v63_v4 = vld [vmem:[#allocation2 + $0x8] sm:$0xff] }
  0x25   :  { %338 = vmatprep.subr.mxu0 %v1349_v26  ;;  %227 = vmatpush1.msra.mxu1 %v1352_v27  ;;  %p1277_p13 = por %p1276_p12, %p1275_p11 }
  0x26   :  { %339 = vmatpush1.msra.mxu0 %v1352_v27  ;;  %228 = vmatprep.subr.mxu1 %v1356_v28 }
  0x27   :  { %340 = vmatprep.subr.mxu0 %v1356_v28  ;;  %229 = vmatpush1.msra.mxu1 %v1360_v29  ;;  %p1278_p0 = pnand %p1277_p13, %p1271_p10 }
  0x28   :  { %341 = vmatpush1.msra.mxu0 %v1360_v29  ;;  %230 = vmatprep.subr.mxu1 %v1364_v30 }
  0x29   :  { %342 = vmatprep.subr.mxu0 %v1364_v30  ;;  %231 = vmatpush1.msra.mxu1 %v1368_v31 }
  0x2a   :  { %343 = vmatpush1.msra.mxu0 %v1368_v31  ;;  %232 = vmatprep.subr.mxu1 %v1372_v32 }
  0x2b   :  { %344 = vmatprep.subr.mxu0 %v1372_v32  ;;  %233 = vmatpush1.msra.mxu1 %v1376_v33 }
  0x2c   :  { %345 = vmatpush1.msra.mxu0 %v1376_v33  ;;  %234 = vmatprep.subr.mxu1 %v1380_v34 }
  0x2d   :  { %346 = vmatprep.subr.mxu0 %v1380_v34  ;;  %235 = vmatpush1.msra.mxu1 %v1384_v35 }
  0x2e   :  { %347 = vmatpush1.msra.mxu0 %v1384_v35  ;;  %236 = vmatprep.subr.mxu1 %v1388_v36 }
  0x2f   :  { %348 = vmatprep.subr.mxu0 %v1388_v36  ;;  %237 = vmatpush1.msra.mxu1 %v1397_v40 }
  0x30   :  { %349 = vmatpush1.msra.mxu0 %v1397_v40  ;;  %238 = vmatprep.subr.mxu1 %v1400_v41 }
  0x31   :  { %350 = vmatprep.subr.mxu0 %v1400_v41  ;;  %239 = vmatpush1.msra.mxu1 %v1404_v42 }
  0x32   :  { %351 = vmatpush1.msra.mxu0 %v1404_v42  ;;  %444 = vmatprep.subr.mxu1 %v1345_v24 }
  0x33   :  { %548 = vmatprep.subr.mxu0 %v1345_v24  ;;  %1086 = vmatmul.mubr.msk.f32.gmra.mxu0 %vm75_vm0, %v63_v4 }
  0x34   :  { %384 = vmatprep.mubr.f32.mxu0 %v1302_v0 }
  0xe3   :  { %v148_v11 = vpop.f32.mrf.mxu0 }
  0xe4   :  { %v1341_v17 = vadd.f32 %v148_v11, %v1338_v16 }
  0xe5   :  { %v150_v12 = vpop.f32.mrf.mxu0 }
  0xe6   :  { %v1334_v13 = vadd.f32 %v150_v12, %v1331_v10  ;;  %v1087_v18 = vmul.f32 -1.442695, %v1341_v17  ;;  %v200_v54 = vrot.slane %v1341_v17, 2 }
  0xe8   :  { %1122 = vtanh.f32 %v1334_v13  ;;  %v1088_v44 = vmul.f32 -1.442695, %v1334_v13  ;;  %v201_v57 = vrot.slane %v1334_v13, 2 }
  0xe9   :  { %1124 = vpow2.f32 %v1087_v18 }
  0xf5   :  { %v1123_v14 = vpop.eup %1122 }
  0xf6   :  { %177 = vrot.lane.b32.xlu0 %v1123_v14, %s1303_s0  ;;  %v1125_v19 = vpop.eup %1124 }
  0xf7   :  { %v168_v20 = vadd.f32 1.0, %v1125_v19 }
  0xf9   :  { %1126 = vrcp.f32 %v168_v20  ;;  %v1459_v20 = vpop.f32.mrf.mxu0 }
 0x106   :  { %v1127_v21 = vpop.eup %1126 }
 0x107   :  { %v175_v37 = vmul.f32 0.0, %v1127_v21 }
 0x168   :  { %v178_v22 = vpop.permute.xlu0 %177 }
 0x169   :  { %v180_v23 = vmul.f32 %v1127_v21, %v178_v22  ;;  %v1461_v21 = vpop.f32.mrf.mxu0  ;;  %v313_v22 = vrot.slane %v1341_v17, 4 }
 0x16b   :  { %182 = vrot.lane.b32.xlu0 %v180_v23, %s1303_s0 }
 0x1dd   :  { %v183_v38 = vpop.permute.xlu0 %182 }
 0x1de   :  { %v185_v39 = vadd.f32 %v183_v38, %v175_v37  ;;  %v314_v38 = vrot.slane %v1334_v13, 4 }
 0x1e0   :  { %1128 = vtanh.f32 %v185_v39 }
 0x1e1   :  { %1130 = vpow2.f32 %v1088_v44 }
 0x1ed   :  { %v1129_v43 = vpop.eup %1128 }
 0x1ee   :  { %188 = vrot.lane.b32.xlu1 %v1129_v43, %s1303_s0  ;;  %v1131_v45 = vpop.eup %1130 }
 0x1ef   :  { %v169_v46 = vadd.f32 1.0, %v1131_v45 }
 0x1f1   :  { %1132 = vrcp.f32 %v169_v46 }
 0x1f2   :  { %194 = vrot.lane.b32.xlu1 %v185_v39, %s1303_s0 }
 0x1fe   :  { %v1133_v48 = vpop.eup %1132 }
 0x260   :  { %v189_v49 = vpop.permute.xlu1 %188 }
 0x261   :  { %v191_v50 = vmul.f32 %v1133_v48, %v189_v49 }
 0x263   :  { %v192_v51 = vsel %vm161_vm1, %v191_v50, 0.0 }
 0x264   :  { %1089 = vmatmul.mubr.msk.f32.vlgmr.msra.gmra.mxu1 %vm204_vm2, %v192_v51  ;;  %v195_v52 = vpop.permute.xlu1 %194 }
 0x265   :  { %v197_v53 = vsel %vm161_vm1, %v195_v52, 0.0  ;;  %445 = vmatpush1.msra.mxu1 %v1347_v25  ;;  %492 = vmatprep.mubr.f32.mxu1 %v1302_v0 }
 0x266   :  { %293 = vrot.lane.b32.xlu1 %v197_v53, %s1303_s0  ;;  %446 = vmatprep.subr.mxu1 %v1349_v26 }
 0x267   :  { %447 = vmatpush1.msra.mxu1 %v1352_v27 }
 0x268   :  { %448 = vmatprep.subr.mxu1 %v1356_v28 }
 0x269   :  { %449 = vmatpush1.msra.mxu1 %v1360_v29 }
 0x26a   :  { %450 = vmatprep.subr.mxu1 %v1364_v30 }
 0x26b   :  { %451 = vmatpush1.msra.mxu1 %v1368_v31 }
 0x26c   :  { %452 = vmatprep.subr.mxu1 %v1372_v32 }
 0x26d   :  { %453 = vmatpush1.msra.mxu1 %v1376_v33 }
 0x26e   :  { %454 = vmatprep.subr.mxu1 %v1380_v34 }
 0x26f   :  { %455 = vmatpush1.msra.mxu1 %v1384_v35 }
 0x270   :  { %456 = vmatprep.subr.mxu1 %v1388_v36 }
 0x271   :  { %457 = vmatpush1.msra.mxu1 %v1397_v40 }
 0x272   :  { %458 = vmatprep.subr.mxu1 %v1400_v41 }
 0x273   :  { %459 = vmatpush1.msra.mxu1 %v1404_v42 }
 0x274   :  { %658 = vmatprep.subr.mxu1 %v1345_v24 }
 0x2d8   :  { %v294_v5 = vpop.permute.xlu1 %293 }
 0x324   :  { %v274_v55 = vpop.f32.mrf.mxu1 }
 0x325   :  { %v275_v56 = vadd.f32 %v274_v55, %v200_v54 }
 0x326   :  { %v276_v58 = vpop.f32.mrf.mxu1 }
 0x327   :  { %v277_v59 = vadd.f32 %v276_v58, %v201_v57  ;;  %v1090_v61 = vmul.f32 -1.442695, %v275_v56 }
 0x329   :  { %1134 = vtanh.f32 %v277_v59  ;;  %v1091_v11 = vmul.f32 -1.442695, %v277_v59 }
 0x32a   :  { %1136 = vpow2.f32 %v1090_v61  ;;  %v421_v61 = vrot.slane %v1341_v17, 6 }
 0x336   :  { %v1135_v60 = vpop.eup %1134 }
 0x337   :  { %298 = vrot.lane.b32.xlu0 %v1135_v60, %s1303_s0  ;;  %v1137_v62 = vpop.eup %1136 }
 0x338   :  { %v285_v63 = vadd.f32 1.0, %v1137_v62 }
 0x33a   :  { %1138 = vrcp.f32 %v285_v63 }
 0x347   :  { %v1139_v1 = vpop.eup %1138 }
 0x348   :  { %v296_v6 = vmul.f32 %v1139_v1, %v294_v5 }
 0x3a9   :  { %v299_v2 = vpop.permute.xlu0 %298 }
 0x3aa   :  { %v301_v3 = vmul.f32 %v1139_v1, %v299_v2  ;;  %v422_v1 = vrot.slane %v1334_v13, 6 }
 0x3ac   :  { %303 = vrot.lane.b32.xlu0 %v301_v3, %s1303_s0 }
 0x41e   :  { %v304_v7 = vpop.permute.xlu0 %303 }
 0x41f   :  { %v306_v8 = vadd.f32 %v304_v7, %v296_v6 }
 0x421   :  { %1140 = vtanh.f32 %v306_v8 }
 0x422   :  { %1142 = vpow2.f32 %v1091_v11 }
 0x42e   :  { %v1141_v9 = vpop.eup %1140 }
 0x42f   :  { %309 = vrot.lane.b32.xlu1 %v1141_v9, %s1303_s0  ;;  %v1143_v12 = vpop.eup %1142 }
 0x430   :  { %v286_v14 = vadd.f32 1.0, %v1143_v12 }
 0x432   :  { %1144 = vrcp.f32 %v286_v14 }
 0x43f   :  { %v1145_v15 = vpop.eup %1144 }
 0x4a1   :  { %v310_v18 = vpop.permute.xlu1 %309 }
 0x4a2   :  { %v312_v19 = vmul.f32 %v1145_v15, %v310_v18 }
 0x4a4   :  { %1092 = vmatmul.mubr.msk.f32.vlgmr.msra.gmra.mxu0 %vm204_vm2, %v312_v19 }
 0x4a5   :  { %549 = vmatpush1.msra.mxu0 %v1347_v25  ;;  %596 = vmatprep.mubr.f32.mxu0 %v1302_v0 }
 0x4a6   :  { %550 = vmatprep.subr.mxu0 %v1349_v26 }
 0x4a7   :  { %551 = vmatpush1.msra.mxu0 %v1352_v27 }
 0x4a8   :  { %552 = vmatprep.subr.mxu0 %v1356_v28 }
 0x4a9   :  { %553 = vmatpush1.msra.mxu0 %v1360_v29 }
 0x4aa   :  { %554 = vmatprep.subr.mxu0 %v1364_v30 }
 0x4ab   :  { %555 = vmatpush1.msra.mxu0 %v1368_v31 }
 0x4ac   :  { %556 = vmatprep.subr.mxu0 %v1372_v32 }
 0x4ad   :  { %557 = vmatpush1.msra.mxu0 %v1376_v33 }
 0x4ae   :  { %558 = vmatprep.subr.mxu0 %v1380_v34 }
 0x4af   :  { %559 = vmatpush1.msra.mxu0 %v1384_v35 }
 0x4b0   :  { %560 = vmatprep.subr.mxu0 %v1388_v36 }
 0x4b1   :  { %561 = vmatpush1.msra.mxu0 %v1397_v40 }
 0x4b2   :  { %562 = vmatprep.subr.mxu0 %v1400_v41 }
 0x4b3   :  { %563 = vmatpush1.msra.mxu0 %v1404_v42 }
 0x4b4   :  { %766 = vmatprep.subr.mxu0 %v1345_v24 }
 0x564   :  { %v386_v23 = vpop.f32.mrf.mxu0 }
 0x565   :  { %v387_v37 = vadd.f32 %v386_v23, %v313_v22 }
 0x566   :  { %v388_v39 = vpop.f32.mrf.mxu0 }
 0x567   :  { %v389_v43 = vadd.f32 %v388_v39, %v314_v38  ;;  %v1093_v45 = vmul.f32 -1.442695, %v387_v37  ;;  %v1511_v39 = vadd.f32 %v1461_v21, %v1331_v10 }
 0x569   :  { %1146 = vtanh.f32 %v389_v43  ;;  %v1094_v55 = vmul.f32 -1.442695, %v389_v43 }
 0x56a   :  { %1148 = vpow2.f32 %v1093_v45 }
 0x576   :  { %v1147_v44 = vpop.eup %1146 }
 0x577   :  { %406 = vrot.lane.b32.xlu0 %v1147_v44, %s1303_s0  ;;  %v1149_v46 = vpop.eup %1148 }
 0x578   :  { %v397_v47 = vadd.f32 1.0, %v1149_v46  ;;  %v1517_v46 = vadd.f32 %v1459_v20, %v1338_v16 }
 0x57a   :  { %1150 = vrcp.f32 %v397_v47 }
 0x587   :  { %v1151_v48 = vpop.eup %1150 }
 0x588   :  { %v404_v51 = vmul.f32 %v1151_v48, %v306_v8 }
 0x5e9   :  { %v407_v49 = vpop.permute.xlu0 %406 }
 0x5ea   :  { %v409_v50 = vmul.f32 %v1151_v48, %v407_v49 }
 0x5ec   :  { %411 = vrot.lane.b32.xlu1 %v409_v50, %s1303_s0 }
 0x65e   :  { %v412_v52 = vpop.permute.xlu1 %411 }
 0x65f   :  { %v414_v53 = vadd.f32 %v412_v52, %v404_v51 }
 0x661   :  { %1152 = vtanh.f32 %v414_v53 }
 0x662   :  { %1154 = vpow2.f32 %v1094_v55 }
 0x66e   :  { %v1153_v54 = vpop.eup %1152 }
 0x66f   :  { %417 = vrot.lane.b32.xlu0 %v1153_v54, %s1303_s0  ;;  %v1155_v56 = vpop.eup %1154 }
 0x670   :  { %v398_v57 = vadd.f32 1.0, %v1155_v56 }
 0x672   :  { %1156 = vrcp.f32 %v398_v57 }
 0x67f   :  { %v1157_v58 = vpop.eup %1156 }
 0x6e1   :  { %v418_v59 = vpop.permute.xlu0 %417 }
 0x6e2   :  { %v420_v60 = vmul.f32 %v1157_v58, %v418_v59 }
 0x6e4   :  { %1095 = vmatmul.mubr.msk.f32.vlgmr.msra.gmra.mxu1 %vm204_vm2, %v420_v60 }
 0x6e5   :  { %659 = vmatpush1.msra.mxu1 %v1347_v25  ;;  %706 = vmatprep.mubr.f32.mxu1 %v1302_v0 }
 0x6e6   :  { %660 = vmatprep.subr.mxu1 %v1349_v26 }
 0x6e7   :  { %661 = vmatpush1.msra.mxu1 %v1352_v27 }
 0x6e8   :  { %662 = vmatprep.subr.mxu1 %v1356_v28 }
 0x6e9   :  { %663 = vmatpush1.msra.mxu1 %v1360_v29 }
 0x6ea   :  { %664 = vmatprep.subr.mxu1 %v1364_v30 }
 0x6eb   :  { %665 = vmatpush1.msra.mxu1 %v1368_v31 }
 0x6ec   :  { %666 = vmatprep.subr.mxu1 %v1372_v32 }
 0x6ed   :  { %667 = vmatpush1.msra.mxu1 %v1376_v33 }
 0x6ee   :  { %668 = vmatprep.subr.mxu1 %v1380_v34 }
 0x6ef   :  { %669 = vmatpush1.msra.mxu1 %v1384_v35 }
 0x6f0   :  { %670 = vmatprep.subr.mxu1 %v1388_v36 }
 0x6f1   :  { %671 = vmatpush1.msra.mxu1 %v1397_v40 }
 0x6f2   :  { %672 = vmatprep.subr.mxu1 %v1400_v41 }
 0x6f3   :  { %673 = vmatpush1.msra.mxu1 %v1404_v42 }
 0x6f4   :  { %874 = vmatprep.subr.mxu1 %v1345_v24 }
 0x7a4   :  { %v494_v62 = vpop.f32.mrf.mxu1 }
 0x7a5   :  { %v495_v63 = vadd.f32 %v494_v62, %v421_v61  ;;  %v636_v62 = vrot.slane %v1511_v39, 2 }
 0x7a6   :  { %v496_v2 = vpop.f32.mrf.mxu1 }
 0x7a7   :  { %v497_v3 = vadd.f32 %v496_v2, %v422_v1  ;;  %v1096_v5 = vmul.f32 -1.442695, %v495_v63 }
 0x7a9   :  { %1158 = vtanh.f32 %v497_v3  ;;  %v1097_v15 = vmul.f32 -1.442695, %v497_v3  ;;  %v635_v3 = vrot.slane %v1517_v46, 2 }
 0x7aa   :  { %1160 = vpow2.f32 %v1096_v5 }
 0x7b6   :  { %v1159_v4 = vpop.eup %1158 }
 0x7b7   :  { %514 = vrot.lane.b32.xlu1 %v1159_v4, %s1303_s0  ;;  %v1161_v6 = vpop.eup %1160 }
 0x7b8   :  { %v505_v7 = vadd.f32 1.0, %v1161_v6 }
 0x7ba   :  { %1162 = vrcp.f32 %v505_v7 }
 0x7c7   :  { %v1163_v8 = vpop.eup %1162 }
 0x7c8   :  { %v512_v17 = vmul.f32 %v1163_v8, %v414_v53 }
 0x829   :  { %v515_v9 = vpop.permute.xlu1 %514 }
 0x82a   :  { %v517_v11 = vmul.f32 %v1163_v8, %v515_v9 }
 0x82c   :  { %519 = vrot.lane.b32.xlu0 %v517_v11, %s1303_s0 }
 0x89e   :  { %v520_v12 = vpop.permute.xlu0 %519 }
 0x89f   :  { %v522_v14 = vadd.f32 %v520_v12, %v512_v17 }
 0x8a1   :  { %1164 = vtanh.f32 %v522_v14 }
 0x8a2   :  { %1166 = vpow2.f32 %v1097_v15 }
 0x8ae   :  { %v1165_v13 = vpop.eup %1164 }
 0x8af   :  { %525 = vrot.lane.b32.xlu1 %v1165_v13, %s1303_s0  ;;  %v1167_v18 = vpop.eup %1166 }
 0x8b0   :  { %v506_v19 = vadd.f32 1.0, %v1167_v18 }
 0x8b2   :  { %1168 = vrcp.f32 %v506_v19 }
 0x8bf   :  { %v1169_v22 = vpop.eup %1168 }
 0x921   :  { %v526_v23 = vpop.permute.xlu1 %525 }
 0x922   :  { %v528_v37 = vmul.f32 %v1169_v22, %v526_v23 }
 0x924   :  { %1098 = vmatmul.mubr.msk.f32.vlgmr.msra.gmra.mxu0 %vm204_vm2, %v528_v37 }
 0x925   :  { %767 = vmatpush1.msra.mxu0 %v1347_v25  ;;  %814 = vmatprep.mubr.f32.mxu0 %v1302_v0 }
 0x926   :  { %768 = vmatprep.subr.mxu0 %v1349_v26 }
 0x927   :  { %769 = vmatpush1.msra.mxu0 %v1352_v27 }
 0x928   :  { %770 = vmatprep.subr.mxu0 %v1356_v28 }
 0x929   :  { %771 = vmatpush1.msra.mxu0 %v1360_v29 }
 0x92a   :  { %772 = vmatprep.subr.mxu0 %v1364_v30 }
 0x92b   :  { %773 = vmatpush1.msra.mxu0 %v1368_v31 }
 0x92c   :  { %774 = vmatprep.subr.mxu0 %v1372_v32 }
 0x92d   :  { %775 = vmatpush1.msra.mxu0 %v1376_v33 }
 0x92e   :  { %776 = vmatprep.subr.mxu0 %v1380_v34 }
 0x92f   :  { %777 = vmatpush1.msra.mxu0 %v1384_v35 }
 0x930   :  { %778 = vmatprep.subr.mxu0 %v1388_v36 }
 0x931   :  { %779 = vmatpush1.msra.mxu0 %v1397_v40 }
 0x932   :  { %780 = vmatprep.subr.mxu0 %v1400_v41 }
 0x933   :  { %781 = vmatpush1.msra.mxu0 %v1404_v42 }
 0x934   :  { %978 = vmatprep.subr.mxu0 %v1345_v24 }
 0x9e4   :  { %v598_v38 = vpop.f32.mrf.mxu0 }
 0x9e5   :  { %v599_v47 = vadd.f32 %v598_v38, %v1517_v46 }
 0x9e6   :  { %v600_v43 = vpop.f32.mrf.mxu0 }
 0x9e7   :  { %v601_v44 = vadd.f32 %v600_v43, %v1511_v39  ;;  %v1099_v48 = vmul.f32 -1.442695, %v599_v47 }
 0x9e9   :  { %1170 = vtanh.f32 %v601_v44  ;;  %v1100_v20 = vmul.f32 -1.442695, %v601_v44 }
 0x9ea   :  { %1172 = vpow2.f32 %v1099_v48 }
 0x9f6   :  { %v1171_v45 = vpop.eup %1170 }
 0x9f7   :  { %618 = vrot.lane.b32.xlu0 %v1171_v45, %s1303_s0  ;;  %v1173_v24 = vpop.eup %1172 }
 0x9f8   :  { %v609_v49 = vadd.f32 1.0, %v1173_v24 }
 0x9fa   :  { %1174 = vrcp.f32 %v609_v49 }
 0xa07   :  { %v1175_v21 = vpop.eup %1174 }
 0xa08   :  { %v616_v52 = vmul.f32 %v1175_v21, %v522_v14 }
 0xa69   :  { %v619_v50 = vpop.permute.xlu0 %618 }
 0xa6a   :  { %v621_v51 = vmul.f32 %v1175_v21, %v619_v50  ;;  %v852_v21 = vrot.slane %v1511_v39, 6 }
 0xa6c   :  { %623 = vrot.lane.b32.xlu1 %v621_v51, %s1303_s0 }
 0xade   :  { %v624_v53 = vpop.permute.xlu1 %623 }
 0xadf   :  { %v626_v54 = vadd.f32 %v624_v53, %v616_v52  ;;  %v851_v53 = vrot.slane %v1517_v46, 6 }
 0xae1   :  { %1176 = vtanh.f32 %v626_v54 }
 0xae2   :  { %1178 = vpow2.f32 %v1100_v20 }
 0xaee   :  { %v1177_v55 = vpop.eup %1176 }
 0xaef   :  { %629 = vrot.lane.b32.xlu0 %v1177_v55, %s1303_s0  ;;  %v1179_v56 = vpop.eup %1178 }
 0xaf0   :  { %v610_v57 = vadd.f32 1.0, %v1179_v56 }
 0xaf2   :  { %1180 = vrcp.f32 %v610_v57 }
 0xaff   :  { %v1181_v58 = vpop.eup %1180 }
 0xb61   :  { %v630_v59 = vpop.permute.xlu0 %629 }
 0xb62   :  { %v632_v60 = vmul.f32 %v1181_v58, %v630_v59 }
 0xb64   :  { %1101 = vmatmul.mubr.msk.f32.vlgmr.msra.gmra.mxu1 %vm204_vm2, %v632_v60 }
 0xb65   :  { %875 = vmatpush1.msra.mxu1 %v1347_v25  ;;  %922 = vmatprep.mubr.f32.mxu1 %v1302_v0 }
 0xb66   :  { %876 = vmatprep.subr.mxu1 %v1349_v26 }
 0xb67   :  { %877 = vmatpush1.msra.mxu1 %v1352_v27 }
 0xb68   :  { %878 = vmatprep.subr.mxu1 %v1356_v28 }
 0xb69   :  { %879 = vmatpush1.msra.mxu1 %v1360_v29 }
 0xb6a   :  { %880 = vmatprep.subr.mxu1 %v1364_v30 }
 0xb6b   :  { %881 = vmatpush1.msra.mxu1 %v1368_v31 }
 0xb6c   :  { %882 = vmatprep.subr.mxu1 %v1372_v32 }
 0xb6d   :  { %883 = vmatpush1.msra.mxu1 %v1376_v33 }
 0xb6e   :  { %884 = vmatprep.subr.mxu1 %v1380_v34 }
 0xb6f   :  { %885 = vmatpush1.msra.mxu1 %v1384_v35 }
 0xb70   :  { %886 = vmatprep.subr.mxu1 %v1388_v36 }
 0xb71   :  { %887 = vmatpush1.msra.mxu1 %v1397_v40 }
 0xb72   :  { %888 = vmatprep.subr.mxu1 %v1400_v41 }
 0xb73   :  { %889 = vmatpush1.msra.mxu1 %v1404_v42 }
 0xc24   :  { %v708_v61 = vpop.f32.mrf.mxu1 }
 0xc25   :  { %v709_v4 = vadd.f32 %v708_v61, %v635_v3 }
 0xc26   :  { %v710_v63 = vpop.f32.mrf.mxu1 }
 0xc27   :  { %v711_v1 = vadd.f32 %v710_v63, %v636_v62  ;;  %v1102_v5 = vmul.f32 -1.442695, %v709_v4 }
 0xc29   :  { %1182 = vtanh.f32 %v711_v1  ;;  %v1103_v15 = vmul.f32 -1.442695, %v711_v1 }
 0xc2a   :  { %1184 = vpow2.f32 %v1102_v5 }
 0xc36   :  { %v1183_v2 = vpop.eup %1182 }
 0xc37   :  { %728 = vrot.lane.b32.xlu1 %v1183_v2, %s1303_s0  ;;  %v1185_v6 = vpop.eup %1184 }
 0xc38   :  { %v719_v7 = vadd.f32 1.0, %v1185_v6 }
 0xc3a   :  { %1186 = vrcp.f32 %v719_v7 }
 0xc47   :  { %v1187_v8 = vpop.eup %1186 }
 0xc48   :  { %v726_v17 = vmul.f32 %v1187_v8, %v626_v54 }
 0xca9   :  { %v729_v9 = vpop.permute.xlu1 %728 }
 0xcaa   :  { %v731_v11 = vmul.f32 %v1187_v8, %v729_v9 }
 0xcac   :  { %733 = vrot.lane.b32.xlu0 %v731_v11, %s1303_s0 }
 0xd1e   :  { %v734_v12 = vpop.permute.xlu0 %733 }
 0xd1f   :  { %v736_v14 = vadd.f32 %v734_v12, %v726_v17 }
 0xd21   :  { %1188 = vtanh.f32 %v736_v14 }
 0xd22   :  { %1190 = vpow2.f32 %v1103_v15 }
 0xd2e   :  { %v1189_v13 = vpop.eup %1188 }
 0xd2f   :  { %739 = vrot.lane.b32.xlu1 %v1189_v13, %s1303_s0  ;;  %v1191_v18 = vpop.eup %1190 }
 0xd30   :  { %v720_v19 = vadd.f32 1.0, %v1191_v18 }
 0xd32   :  { %1192 = vrcp.f32 %v720_v19 }
 0xd3f   :  { %v1193_v22 = vpop.eup %1192 }
 0xda1   :  { %v740_v23 = vpop.permute.xlu1 %739 }
 0xda2   :  { %v742_v37 = vmul.f32 %v1193_v22, %v740_v23 }
 0xda4   :  { %1104 = vmatmul.mubr.msk.f32.vlgmr.msra.gmra.mxu0 %vm204_vm2, %v742_v37 }
 0xda5   :  { %979 = vmatpush1.msra.mxu0 %v1347_v25  ;;  %1026 = vmatprep.mubr.f32.mxu0 %v1302_v0  ;;  %v744_v25 = vrot.slane %v1511_v39, 4 }
 0xda6   :  { %980 = vmatprep.subr.mxu0 %v1349_v26 }
 0xda7   :  { %981 = vmatpush1.msra.mxu0 %v1352_v27 }
 0xda8   :  { %982 = vmatprep.subr.mxu0 %v1356_v28 }
 0xda9   :  { %983 = vmatpush1.msra.mxu0 %v1360_v29  ;;  %v743_v29 = vrot.slane %v1517_v46, 4 }
 0xdaa   :  { %984 = vmatprep.subr.mxu0 %v1364_v30 }
 0xdab   :  { %985 = vmatpush1.msra.mxu0 %v1368_v31 }
 0xdac   :  { %986 = vmatprep.subr.mxu0 %v1372_v32 }
 0xdad   :  { %987 = vmatpush1.msra.mxu0 %v1376_v33 }
 0xdae   :  { %988 = vmatprep.subr.mxu0 %v1380_v34 }
 0xdaf   :  { %989 = vmatpush1.msra.mxu0 %v1384_v35 }
 0xdb0   :  { %990 = vmatprep.subr.mxu0 %v1388_v36 }
 0xdb1   :  { %991 = vmatpush1.msra.mxu0 %v1397_v40 }
 0xdb2   :  { %992 = vmatprep.subr.mxu0 %v1400_v41 }
 0xdb3   :  { %993 = vmatpush1.msra.mxu0 %v1404_v42 }
 0xe64   :  { %v816_v0 = vpop.f32.mrf.mxu0 }
 0xe65   :  { %v817_v30 = vadd.f32 %v816_v0, %v743_v29 }
 0xe66   :  { %v818_v26 = vpop.f32.mrf.mxu0 }
 0xe67   :  { %v819_v27 = vadd.f32 %v818_v26, %v744_v25  ;;  %v1105_v31 = vmul.f32 -1.442695, %v817_v30 }
 0xe69   :  { %1194 = vtanh.f32 %v819_v27  ;;  %v1106_v43 = vmul.f32 -1.442695, %v819_v27 }
 0xe6a   :  { %1196 = vpow2.f32 %v1105_v31 }
 0xe76   :  { %v1195_v28 = vpop.eup %1194 }
 0xe77   :  { %836 = vrot.lane.b32.xlu0 %v1195_v28, %s1303_s0  ;;  %v1197_v32 = vpop.eup %1196 }
 0xe78   :  { %v827_v33 = vadd.f32 1.0, %v1197_v32 }
 0xe7a   :  { %1198 = vrcp.f32 %v827_v33 }
 0xe87   :  { %v1199_v34 = vpop.eup %1198 }
 0xe88   :  { %v834_v40 = vmul.f32 %v1199_v34, %v736_v14 }
 0xee9   :  { %v837_v35 = vpop.permute.xlu0 %836 }
 0xeea   :  { %v839_v36 = vmul.f32 %v1199_v34, %v837_v35 }
 0xeec   :  { %841 = vrot.lane.b32.xlu1 %v839_v36, %s1303_s0 }
 0xf5e   :  { %v842_v41 = vpop.permute.xlu1 %841 }
 0xf5f   :  { %v844_v42 = vadd.f32 %v842_v41, %v834_v40 }
 0xf61   :  { %1200 = vtanh.f32 %v844_v42 }
 0xf62   :  { %1202 = vpow2.f32 %v1106_v43 }
 0xf6e   :  { %v1201_v38 = vpop.eup %1200 }
 0xf6f   :  { %847 = vrot.lane.b32.xlu0 %v1201_v38, %s1303_s0  ;;  %v1203_v44 = vpop.eup %1202 }
 0xf70   :  { %v828_v45 = vadd.f32 1.0, %v1203_v44 }
 0xf72   :  { %1204 = vrcp.f32 %v828_v45 }
 0xf7f   :  { %v1205_v47 = vpop.eup %1204 }
 0xfe1   :  { %v848_v48 = vpop.permute.xlu0 %847 }
 0xfe2   :  { %v850_v24 = vmul.f32 %v1205_v47, %v848_v48 }
 0xfe4   :  { %1107 = vmatmul.mubr.msk.f32.vlgmr.msra.gmra.mxu1 %vm204_vm2, %v850_v24 }
0x10a4   :  { %v924_v49 = vpop.f32.mrf.mxu1 }
0x10a5   :  { %v925_v54 = vadd.f32 %v924_v49, %v851_v53 }
0x10a6   :  { %v926_v50 = vpop.f32.mrf.mxu1 }
0x10a7   :  { %v927_v51 = vadd.f32 %v926_v50, %v852_v21  ;;  %v1108_v55 = vmul.f32 -1.442695, %v925_v54 }
0x10a9   :  { %1206 = vtanh.f32 %v927_v51  ;;  %v1109_v63 = vmul.f32 -1.442695, %v927_v51 }
0x10aa   :  { %1208 = vpow2.f32 %v1108_v55 }
0x10b6   :  { %v1207_v52 = vpop.eup %1206 }
0x10b7   :  { %944 = vrot.lane.b32.xlu1 %v1207_v52, %s1303_s0  ;;  %v1209_v20 = vpop.eup %1208 }
0x10b8   :  { %v935_v56 = vadd.f32 1.0, %v1209_v20 }
0x10ba   :  { %1210 = vrcp.f32 %v935_v56 }
0x10c7   :  { %v1211_v57 = vpop.eup %1210 }
0x10c8   :  { %v942_v39 = vmul.f32 %v1211_v57, %v844_v42 }
0x1129   :  { %v945_v58 = vpop.permute.xlu1 %944 }
0x112a   :  { %v947_v59 = vmul.f32 %v1211_v57, %v945_v58 }
0x112c   :  { %949 = vrot.lane.b32.xlu0 %v947_v59, %s1303_s0 }
0x119e   :  { %v950_v60 = vpop.permute.xlu0 %949 }
0x119f   :  { %v952_v61 = vadd.f32 %v950_v60, %v942_v39 }
0x11a1   :  { %1212 = vtanh.f32 %v952_v61 }
0x11a2   :  { %1214 = vpow2.f32 %v1109_v63 }
0x11ae   :  { %v1213_v62 = vpop.eup %1212 }
0x11af   :  { %955 = vrot.lane.b32.xlu1 %v1213_v62, %s1303_s0  ;;  %v1215_v46 = vpop.eup %1214 }
0x11b0   :  { %v936_v1 = vadd.f32 1.0, %v1215_v46 }
0x11b2   :  { %1216 = vrcp.f32 %v936_v1 }
0x11bf   :  { %v1217_v2 = vpop.eup %1216 }
0x1221   :  { %v956_v3 = vpop.permute.xlu1 %955 }
0x1222   :  { %v958_v4 = vmul.f32 %v1217_v2, %v956_v3 }
0x1224   :  { %1110 = vmatmul.mubr.msk.f32.vlgmr.msra.gmra.mxu0 %vm204_vm2, %v958_v4 }
0x12e4   :  { %v1028_v5 = vpop.f32.mrf.mxu0 }
0x12e5   :  { %v1029_v9 = vadd.f32 %v1028_v5, %v1338_v16 }
0x12e6   :  { %v1030_v6 = vpop.f32.mrf.mxu0 }
0x12e7   :  { %v1031_v7 = vadd.f32 %v1030_v6, %v1331_v10  ;;  %v1111_v11 = vmul.f32 -1.442695, %v1029_v9 }
0x12e9   :  { %1218 = vtanh.f32 %v1031_v7  ;;  %v1112_v23 = vmul.f32 -1.442695, %v1031_v7 }
0x12ea   :  { %1220 = vpow2.f32 %v1111_v11 }
0x12f6   :  { %v1219_v8 = vpop.eup %1218 }
0x12f7   :  { %1048 = vrot.lane.b32.xlu0 %v1219_v8, %s1303_s0  ;;  %v1221_v17 = vpop.eup %1220 }
0x12f8   :  { %v1039_v12 = vadd.f32 1.0, %v1221_v17 }
0x12fa   :  { %1222 = vrcp.f32 %v1039_v12 }
0x1307   :  { %v1223_v14 = vpop.eup %1222 }
0x1308   :  { %v1046_v18 = vmul.f32 %v1223_v14, %v952_v61 }
0x1369   :  { %v1049_v13 = vpop.permute.xlu0 %1048 }
0x136a   :  { %v1051_v15 = vmul.f32 %v1223_v14, %v1049_v13 }
0x136c   :  { %1053 = vrot.lane.b32.xlu1 %v1051_v15, %s1303_s0 }
0x13de   :  { %v1054_v19 = vpop.permute.xlu1 %1053 }
0x13df   :  { %v1056_v22 = vadd.f32 %v1054_v19, %v1046_v18 }
0x13e1   :  { %1224 = vtanh.f32 %v1056_v22 }
0x13e2   :  { %1226 = vpow2.f32 %v1112_v23 }
0x13ee   :  { %v1225_v10 = vpop.eup %1224 }
0x13ef   :  { %1059 = vrot.lane.b32.xlu0 %v1225_v10, %s1303_s0  ;;  %v1227_v16 = vpop.eup %1226 }
0x13f0   :  { %v1040_v37 = vadd.f32 1.0, %v1227_v16 }
0x13f2   :  { %1228 = vrcp.f32 %v1040_v37 }
0x13ff   :  { %v1229_v0 = vpop.eup %1228 }
0x1461   :  { %v1060_v25 = vpop.permute.xlu0 %1059 }
0x1462   :  { %v1062_v26 = vmul.f32 %v1229_v0, %v1060_v25 }
0x1464   :  { %v1064_v27 = vsel %vm1063_vm3, %v958_v4, %v1062_v26 }
0x1465   :  { %v1065_v28 = vsel %vm204_vm2, %v1064_v27, %v952_v61 }
0x1466   :  { %v1067_v29 = vsel %vm1066_vm4, %v1065_v28, %v1056_v22 }
0x1467   :  { %1068 = vst [vmem:[#allocation7] sm:$0x3] %v1067_v29 }
0x1468   :  { %1281 = shalt.err (!%p1278_p0)
}
0x1469   :  { %1078 = dma.vmem_to_hbm [thread:$0]  %s1076_s23, 32, %s1584_s2, [#allocation4]  }
0x146a   :  { %1294 = dma.done.wait [#allocation4], 32  }
0x146b   :  { %1295 = vsyncadd [#allocation4], 4294967264 }
0x146c   :  { %1082 = vsyncpa [#allocation3], 1 }
0x146d   :  { %1083 = vsyncpa [#allocation6], 1 }
0x146e   :  { %1084 = vsyncpa [#allocation4], 1 }

</bundles_post_ra>
